<compile_context>
chip_gen: v5e
topology: v5e:2x2
jax: 0.10.0
libtpu: 0.0.40
codegen_flags: <defaults>
</compile_context>

<pallas_src>
import jax
import jax.numpy as jnp
from jax.experimental import pallas as pl
from jax.experimental.pallas import tpu as pltpu


def _round_up(n, m):
    return ((n + m - 1) // m) * m


def _cdiv(a, b):
    return (a + b - 1) // b


# ---------------------------------------------------------------------------
# Kernel
# ---------------------------------------------------------------------------
def firm_embedding_kernel(x_ref,
                          w1_ref, b1_ref,
                          w2_ref, b2_ref,
                          w3_ref, b3_ref,
                          w4_ref, b4_ref,
                          o_ref,
                          h_scr, m_scr, l_scr):
    """Grid = (batch_tile i, pass p in {0,1}, firm_tile j).

    pass 0: (j == 0) run the MLP trunk once and cache it; for every j update an
            online logsumexp over the firm tiles into (m_scr, l_scr).
    pass 1: recompute this firm tile's logits from the cached activations and
            write log_softmax = logits - (m + log(l)).
    """
    p = pl.program_id(1)
    j = pl.program_id(2)

    @pl.when(jnp.logical_and(p == 0, j == 0))
    def _():
        # relu(linear1) -> relu(linear2) -> relu(linear3); dropout == identity.
        h = jnp.dot(x_ref[...], w1_ref[...], preferred_element_type=jnp.float32)
        h = jnp.maximum(h + b1_ref[...], 0.0)
        h = jnp.dot(h.astype(jnp.bfloat16), w2_ref[...],
                    preferred_element_type=jnp.float32)
        h = jnp.maximum(h + b2_ref[...], 0.0)
        h = jnp.dot(h.astype(jnp.bfloat16), w3_ref[...],
                    preferred_element_type=jnp.float32)
        h = jnp.maximum(h + b3_ref[...], 0.0)
        h_scr[...] = h.astype(jnp.bfloat16)
        m_scr[...] = jnp.full_like(m_scr, -jnp.inf)
        l_scr[...] = jnp.zeros_like(l_scr)

    # Logits for this firm tile (padded firm columns carry zero weights and a
    # -1e30 bias, so exp() underflows to exactly 0 in the normalizer).
    logits = jnp.dot(h_scr[...], w4_ref[...],
                     preferred_element_type=jnp.float32) + b4_ref[...]

    @pl.when(p == 0)
    def _():
        # Online logsumexp accumulation over firm tiles.
        m_prev = m_scr[...]
        m_new = jnp.maximum(m_prev, jnp.max(logits, axis=-1, keepdims=True))
        l_scr[...] = (l_scr[...] * jnp.exp(m_prev - m_new)
                      + jnp.sum(jnp.exp(logits - m_new), axis=-1, keepdims=True))
        m_scr[...] = m_new

    @pl.when(p == 1)
    def _():
        denom = m_scr[...] + jnp.log(l_scr[...])
        o_ref[...] = (logits - denom).astype(o_ref.dtype)


# ---------------------------------------------------------------------------
# Sizing helpers
# ---------------------------------------------------------------------------
def _vmem_capacity_bytes():
    """Generation-aware VMEM capacity (128 MiB v5e/v6e, 64 MiB per-TC v7x)."""
    try:
        info = pltpu.get_tpu_info()
        for attr in ("vmem_capacity_bytes", "vmem_bytes", "vmem_size_bytes"):
            v = getattr(info, attr, None)
            if v:
                return int(v)
    except Exception:
        pass
    return 64 * 1024 * 1024  # conservative fallback (v7x-sized)


def _vmem_estimate(tb, tn, input_dim, hidden_dim, emb_dim,
                   resident_weight_bytes, out_itemsize):
    """Single consistent VMEM estimate used for both tile picking and the limit."""
    lane = 128
    est = resident_weight_bytes
    # Double-buffered pipelined blocks.
    est += 2 * tb * _round_up(input_dim, lane) * 2            # x tile (bf16)
    est += 2 * _round_up(emb_dim, 16) * tn * 2                # w4 tile (bf16)
    est += 2 * 8 * tn * 4                                     # b4 tile (f32)
    est += 2 * tb * tn * out_itemsize                         # output tile
    # Persistent scratch.
    est += tb * _round_up(emb_dim, lane) * 2                  # cached activations
    est += 2 * tb * lane * 4                                  # running max / sum
    # In-kernel live f32 temporaries: logits, exp(logits - m), store staging.
    est += 3 * tb * tn * 4
    # Trunk temporaries during the (p==0, j==0) step.
    est += 2 * tb * _round_up(max(hidden_dim, emb_dim, input_dim), lane) * 4
    return est


def _pick_tiles(batch, n_pad128, est_fn, budget, batch_tile=None, firm_tile=None):
    tb = 512 if batch_tile is None else max(8, _round_up(int(batch_tile), 8))
    tn = 2048 if firm_tile is None else max(128, _round_up(int(firm_tile), 128))
    tb = min(tb, _round_up(batch, 8))
    tn = min(tn, n_pad128)

    # Shrink within the VMEM budget; prefer shrinking the firm tile first so
    # tb stays >= 256 (MXU M-dim fill, fewer ~0.35us grid-step overheads).
    while est_fn(tb, tn) > budget:
        if tn > 512:
            tn = max(512, _round_up(tn // 2, 128))
        elif tb > 256:
            tb = max(256, _round_up(tb // 2, 8))
        elif tn > 128:
            tn = max(128, _round_up(tn // 2, 128))
        elif tb > 8:
            tb = max(8, _round_up(tb // 2, 8))
        else:
            break

    # v7x megacore: keep >=2 batch tiles when the batch allows it so the
    # "parallel" grid axis can be sharded across both TensorCores.
    if batch_tile is None and batch > 8 and _cdiv(_round_up(batch, 8), tb) < 2:
        tb = min(tb, max(8, _round_up(_cdiv(batch, 2), 8)))
    return tb, tn


# ---------------------------------------------------------------------------
# Wrapper
# ---------------------------------------------------------------------------
def firm_embedding_forward(x, params, *, batch_tile=None, firm_tile=None,
                           out_dtype=jnp.bfloat16):
    """x: (B, input_dim) f32. params: w{n}: (in, out), b{n}: (1, out) (transposed vs PyTorch).

    out_dtype defaults to bf16 (halves the dominant output writeback traffic);
    pass jnp.float32 for full-precision log-probs.
    """
    B, input_dim = x.shape
    hidden_dim = params["w1"].shape[1]
    emb_dim = params["w3"].shape[1]
    num_firms = params["w4"].shape[1]

    # bf16 matmul operands; f32 biases / elementwise / softmax math.
    w1, w2, w3, w4 = (params[f"w{i}"].astype(jnp.bfloat16) for i in (1, 2, 3, 4))
    b1, b2, b3, b4 = (params[f"b{i}"].astype(jnp.float32) for i in (1, 2, 3, 4))

    out_itemsize = jnp.dtype(out_dtype).itemsize

    # Resident (single-copy VMEM) trunk weights, counted with layout padding.
    resident_weight_bytes = 0
    for w in (w1, w2, w3):
        resident_weight_bytes += _round_up(w.shape[0], 16) * _round_up(w.shape[1], 128) * 2
    for b in (b1, b2, b3):
        resident_weight_bytes += 8 * _round_up(b.shape[1], 128) * 4

    capacity = _vmem_capacity_bytes()
    budget = int(0.65 * capacity)   # ~83 MiB on v5e/v6e, ~41 MiB on v7x

    def est_fn(tb_, tn_):
        return _vmem_estimate(tb_, tn_, input_dim, hidden_dim, emb_dim,
                              resident_weight_bytes, out_itemsize)

    n_pad128 = _round_up(num_firms, 128)
    tb, tn = _pick_tiles(B, n_pad128, est_fn, budget, batch_tile, firm_tile)

    # Lane-dense output: pad firms to a multiple of the firm tile.  Padded
    # columns get zero weights and a -1e30 bias -> exp() underflows to 0.
    n_pad = _round_up(num_firms, tn)
    if n_pad != num_firms:
        w4 = jnp.pad(w4, ((0, 0), (0, n_pad - num_firms)))
        b4 = jnp.pad(b4, ((0, 0), (0, n_pad - num_firms)), constant_values=-1e30)

    # Ragged batch: zero-pad rows, slice back after the call.
    B_pad = _round_up(B, tb)
    if B_pad != B:
        x = jnp.pad(x, ((0, B_pad - B), (0, 0)))
    x = x.astype(jnp.bfloat16)

    nb = B_pad // tb
    nj = n_pad // tn

    def resident():
        # Single VMEM-resident copy; not re-DMA'd / double-buffered per step.
        return pl.BlockSpec(memory_space=pltpu.MemorySpace.VMEM)

    grid_spec = pltpu.PrefetchScalarGridSpec(
        num_scalar_prefetch=0,
        grid=(nb, 2, nj),
        in_specs=[
            # x tile: resident across the (pass, firm) axes -> one DMA per batch tile.
            pl.BlockSpec((tb, input_dim), lambda i, p, j: (i, 0)),
            resident(), resident(),   # w1, b1
            resident(), resident(),   # w2, b2
            resident(), resident(),   # w3, b3
            # firm_embedding weight / bias streamed per firm tile.
            pl.BlockSpec((emb_dim, tn), lambda i, p, j: (0, j)),
            pl.BlockSpec((1, tn), lambda i, p, j: (0, j)),
        ],
        # During pass 0 the output block index stays at (i, 0) (resident, never
        # written back); pass 1 walks the firm tiles and writes each block once.
        out_specs=pl.BlockSpec((tb, tn), lambda i, p, j: (i, p * j)),
        scratch_shapes=[
            pltpu.VMEM((tb, emb_dim), jnp.bfloat16),   # cached trunk activations
            pltpu.VMEM((tb, 1), jnp.float32),          # running max
            pltpu.VMEM((tb, 1), jnp.float32),          # running sum of exp
        ],
    )

    est = est_fn(tb, tn)
    vmem_limit = int(min(int(0.85 * capacity),            # headroom below physical
                         max(32 * 1024 * 1024, int(1.3 * est))))

    out = pl.pallas_call(
        firm_embedding_kernel,
        out_shape=jax.ShapeDtypeStruct((B_pad, n_pad), out_dtype),
        grid_spec=grid_spec,
        compiler_params=pltpu.CompilerParams(
            dimension_semantics=("parallel", "arbitrary", "arbitrary"),
            vmem_limit_bytes=vmem_limit),
    )(x, w1, b1, w2, b2, w3, b3, w4, b4)

    return out[:B, :num_firms]


# ---------------------------------------------------------------------------
# Params / reference
# ---------------------------------------------------------------------------
def init_params(key, input_dim, hidden_layer_dim, embedding_dim, num_firms):
    """Deterministic init mirroring init_weights(): weight ~ N(0, 0.1)."""
    ks = jax.random.split(key, 8)
    dims = [(input_dim, hidden_layer_dim),
            (hidden_layer_dim, hidden_layer_dim),
            (hidden_layer_dim, embedding_dim),
            (embedding_dim, num_firms)]
    params = {}
    for n, (din, dout) in enumerate(dims, start=1):
        w = 0.1 * jax.random.normal(ks[2 * (n - 1)], (din, dout), jnp.float32)
        # PyTorch default bias init: U(-1/sqrt(fan_in), 1/sqrt(fan_in))
        bound = 1.0 / (din ** 0.5)
        b = jax.random.uniform(ks[2 * (n - 1) + 1], (1, dout), jnp.float32,
                               minval=-bound, maxval=bound)
        params[f"w{n}"] = w
        params[f"b{n}"] = b
    return params


def reference_forward(x, params):
    """Pure-JAX reference using the same bf16-matmul / f32-accumulate recipe."""
    bf16, f32 = jnp.bfloat16, jnp.float32
    h = x.astype(bf16)
    for i in (1, 2, 3):
        w = params[f"w{i}"].astype(bf16)
        b = params[f"b{i}"].astype(f32)
        h = jnp.maximum(jnp.dot(h, w, preferred_element_type=f32) + b, 0.0)
        h = h.astype(bf16)
    logits = jnp.dot(h, params["w4"].astype(bf16),
                     preferred_element_type=f32) + params["b4"].astype(f32)
    return jax.nn.log_softmax(logits, axis=1)


if __name__ == "__main__":
    key = jax.random.PRNGKey(0)
    kx, kp, kx2, kp2 = jax.random.split(key, 4)

    # Config 1: small shapes; num_firms=100 and batch=10 exercise the
    # pad-to-128 (firms), pad-to-tile (batch) and >=2-batch-tile paths.
    input_dim, hidden_dim, emb_dim, num_firms = 32, 32, 16, 100
    batch = 10
    x = jax.random.normal(kx, (batch, input_dim), jnp.float32)
    params = init_params(kp, input_dim, hidden_dim, emb_dim, num_firms)

    out_f32 = jax.block_until_ready(
        firm_embedding_forward(x, params, out_dtype=jnp.float32))
    ref = reference_forward(x, params)
    assert out_f32.shape == (batch, num_firms), out_f32.shape
    assert bool(jnp.all(jnp.isfinite(out_f32)))
    assert jnp.allclose(out_f32, ref, atol=2e-3, rtol=2e-3), \
        float(jnp.max(jnp.abs(out_f32 - ref)))

    # Default bf16-output path (halves the dominant HBM writeback traffic).
    out_bf16 = jax.block_until_ready(firm_embedding_forward(x, params))
    assert out_bf16.dtype == jnp.bfloat16
    assert jnp.allclose(out_bf16.astype(jnp.float32), ref, atol=1e-1, rtol=5e-2)

    # Config 2: multiple firm tiles (firm_tile=128, num_firms=300 -> 3 tiles)
    # to exercise the two-pass online logsumexp over the firms grid axis.
    num_firms2, batch2 = 300, 20
    x2 = jax.random.normal(kx2, (batch2, input_dim), jnp.float32)
    params2 = init_params(kp2, input_dim, hidden_dim, emb_dim, num_firms2)
    out2 = jax.block_until_ready(
        firm_embedding_forward(x2, params2, firm_tile=128, out_dtype=jnp.float32))
    ref2 = reference_forward(x2, params2)
    assert out2.shape == (batch2, num_firms2), out2.shape
    assert bool(jnp.all(jnp.isfinite(out2)))
    assert jnp.allclose(out2, ref2, atol=2e-3, rtol=2e-3), \
        float(jnp.max(jnp.abs(out2 - ref2)))

    print("KERNEL_OK")
</pallas_src>

<mosaic_0001>
module attributes {stable_mosaic.version = 11 : i64} {
  func.func @firm_embedding_kernel(%arg0: i32, %arg1: i32, %arg2: i32, %arg3: memref<8x32xbf16, #tpu.memory_space<vmem>>, %arg4: memref<32x32xbf16, #tpu.memory_space<vmem>>, %arg5: memref<1x32xf32, #tpu.memory_space<vmem>>, %arg6: memref<32x32xbf16, #tpu.memory_space<vmem>>, %arg7: memref<1x32xf32, #tpu.memory_space<vmem>>, %arg8: memref<32x16xbf16, #tpu.memory_space<vmem>>, %arg9: memref<1x16xf32, #tpu.memory_space<vmem>>, %arg10: memref<16x128xbf16, #tpu.memory_space<vmem>>, %arg11: memref<1x128xf32, #tpu.memory_space<vmem>>, %arg12: memref<8x128xf32, #tpu.memory_space<vmem>>, %arg13: memref<8x16xbf16, #tpu.memory_space<vmem>>, %arg14: memref<8x1xf32, #tpu.memory_space<vmem>>, %arg15: memref<8x1xf32, #tpu.memory_space<vmem>>) attributes {dimension_semantics = [#tpu.dimension_semantics<parallel>, #tpu.dimension_semantics<arbitrary>, #tpu.dimension_semantics<arbitrary>], iteration_bounds = array<i64: 2, 2, 1>, scalar_prefetch = 0 : i64, scratch_operands = 3 : i64, tpu.core_type = #tpu.core_type<tc>, window_params = [{transform_indices = @transform_0, window_bounds = array<i64: 8, 32>}, {pipeline_mode = #tpu.pipeline_mode<synchronous>, transform_indices = @transform_1, window_bounds = array<i64: 32, 32>}, {pipeline_mode = #tpu.pipeline_mode<synchronous>, transform_indices = @transform_2, window_bounds = array<i64: 1, 32>}, {pipeline_mode = #tpu.pipeline_mode<synchronous>, transform_indices = @transform_3, window_bounds = array<i64: 32, 32>}, {pipeline_mode = #tpu.pipeline_mode<synchronous>, transform_indices = @transform_4, window_bounds = array<i64: 1, 32>}, {pipeline_mode = #tpu.pipeline_mode<synchronous>, transform_indices = @transform_5, window_bounds = array<i64: 32, 16>}, {pipeline_mode = #tpu.pipeline_mode<synchronous>, transform_indices = @transform_6, window_bounds = array<i64: 1, 16>}, {transform_indices = @transform_7, window_bounds = array<i64: 16, 128>}, {transform_indices = @transform_8, window_bounds = array<i64: 1, 128>}, {transform_indices = @transform_9, window_bounds = array<i64: 8, 128>}]} {
    %c0_i32 = arith.constant 0 : i32
    %0 = arith.cmpi eq, %arg1, %c0_i32 : i32
    %c0_i32_0 = arith.constant 0 : i32
    %1 = arith.cmpi eq, %arg2, %c0_i32_0 : i32
    %2 = arith.andi %0, %1 : i1
    %3 = arith.extui %2 : i1 to i32
    %c0_i32_1 = arith.constant 0 : i32
    %4 = arith.cmpi ne, %3, %c0_i32_1 : i32
    scf.if %4 {
      %c0_10 = arith.constant 0 : index
      %c0_11 = arith.constant 0 : index
      %17 = vector.load %arg3[%c0_10, %c0_11] : memref<8x32xbf16, #tpu.memory_space<vmem>>, vector<8x32xbf16>
      %c0_12 = arith.constant 0 : index
      %c0_13 = arith.constant 0 : index
      %18 = vector.load %arg4[%c0_12, %c0_13] : memref<32x32xbf16, #tpu.memory_space<vmem>>, vector<32x32xbf16>
      %cst_14 = arith.constant dense<0.000000e+00> : vector<8x32xf32>
      %19 = tpu.matmul %17, %18, %cst_14 {dimension_numbers = #tpu.dot_dimension_numbers<[1], [0], [0], [1], [0, 0, 1, 1], [], []>} : vector<8x32xbf16>, vector<32x32xbf16>, vector<8x32xf32> -> vector<8x32xf32>
      %c0_15 = arith.constant 0 : index
      %c0_16 = arith.constant 0 : index
      %20 = vector.load %arg5[%c0_15, %c0_16] : memref<1x32xf32, #tpu.memory_space<vmem>>, vector<1x32xf32>
      %21 = vector.broadcast %20 : vector<1x32xf32> to vector<8x32xf32>
      %22 = arith.addf %19, %21 : vector<8x32xf32>
      %cst_17 = arith.constant 0.000000e+00 : f32
      %23 = vector.broadcast %cst_17 : f32 to vector<8x32xf32>
      %24 = arith.maximumf %22, %23 : vector<8x32xf32>
      %25 = arith.truncf %24 : vector<8x32xf32> to vector<8x32xbf16>
      %c0_18 = arith.constant 0 : index
      %c0_19 = arith.constant 0 : index
      %26 = vector.load %arg6[%c0_18, %c0_19] : memref<32x32xbf16, #tpu.memory_space<vmem>>, vector<32x32xbf16>
      %cst_20 = arith.constant dense<0.000000e+00> : vector<8x32xf32>
      %27 = tpu.matmul %25, %26, %cst_20 {dimension_numbers = #tpu.dot_dimension_numbers<[1], [0], [0], [1], [0, 0, 1, 1], [], []>} : vector<8x32xbf16>, vector<32x32xbf16>, vector<8x32xf32> -> vector<8x32xf32>
      %c0_21 = arith.constant 0 : index
      %c0_22 = arith.constant 0 : index
      %28 = vector.load %arg7[%c0_21, %c0_22] : memref<1x32xf32, #tpu.memory_space<vmem>>, vector<1x32xf32>
      %29 = vector.broadcast %28 : vector<1x32xf32> to vector<8x32xf32>
      %30 = arith.addf %27, %29 : vector<8x32xf32>
      %cst_23 = arith.constant 0.000000e+00 : f32
      %31 = vector.broadcast %cst_23 : f32 to vector<8x32xf32>
      %32 = arith.maximumf %30, %31 : vector<8x32xf32>
      %33 = arith.truncf %32 : vector<8x32xf32> to vector<8x32xbf16>
      %c0_24 = arith.constant 0 : index
      %c0_25 = arith.constant 0 : index
      %34 = vector.load %arg8[%c0_24, %c0_25] : memref<32x16xbf16, #tpu.memory_space<vmem>>, vector<32x16xbf16>
      %cst_26 = arith.constant dense<0.000000e+00> : vector<8x16xf32>
      %35 = tpu.matmul %33, %34, %cst_26 {dimension_numbers = #tpu.dot_dimension_numbers<[1], [0], [0], [1], [0, 0, 1, 1], [], []>} : vector<8x32xbf16>, vector<32x16xbf16>, vector<8x16xf32> -> vector<8x16xf32>
      %c0_27 = arith.constant 0 : index
      %c0_28 = arith.constant 0 : index
      %36 = vector.load %arg9[%c0_27, %c0_28] : memref<1x16xf32, #tpu.memory_space<vmem>>, vector<1x16xf32>
      %37 = vector.broadcast %36 : vector<1x16xf32> to vector<8x16xf32>
      %38 = arith.addf %35, %37 : vector<8x16xf32>
      %cst_29 = arith.constant 0.000000e+00 : f32
      %39 = vector.broadcast %cst_29 : f32 to vector<8x16xf32>
      %40 = arith.maximumf %38, %39 : vector<8x16xf32>
      %41 = arith.truncf %40 : vector<8x16xf32> to vector<8x16xbf16>
      %c0_30 = arith.constant 0 : index
      %c0_31 = arith.constant 0 : index
      %42 = vector.load %arg13[%c0_30, %c0_31] : memref<8x16xbf16, #tpu.memory_space<vmem>>, vector<8x16xbf16>
      tpu.vector_store %arg13[%c0_30, %c0_31], %41 {strides = array<i32>} : memref<8x16xbf16, #tpu.memory_space<vmem>>, vector<8x16xbf16>,
      %cst_32 = arith.constant 0xFF800000 : f32
      %43 = vector.broadcast %cst_32 : f32 to vector<8x1xf32>
      %c0_33 = arith.constant 0 : index
      %c0_34 = arith.constant 0 : index
      %44 = vector.load %arg14[%c0_33, %c0_34] : memref<8x1xf32, #tpu.memory_space<vmem>>, vector<8x1xf32>
      tpu.vector_store %arg14[%c0_33, %c0_34], %43 {strides = array<i32>} : memref<8x1xf32, #tpu.memory_space<vmem>>, vector<8x1xf32>,
      %cst_35 = arith.constant 0.000000e+00 : f32
      %45 = vector.broadcast %cst_35 : f32 to vector<8x1xf32>
      %c0_36 = arith.constant 0 : index
      %c0_37 = arith.constant 0 : index
      %46 = vector.load %arg15[%c0_36, %c0_37] : memref<8x1xf32, #tpu.memory_space<vmem>>, vector<8x1xf32>
      tpu.vector_store %arg15[%c0_36, %c0_37], %45 {strides = array<i32>} : memref<8x1xf32, #tpu.memory_space<vmem>>, vector<8x1xf32>,
    } else {
    }
    %c0 = arith.constant 0 : index
    %c0_2 = arith.constant 0 : index
    %5 = vector.load %arg13[%c0, %c0_2] : memref<8x16xbf16, #tpu.memory_space<vmem>>, vector<8x16xbf16>
    %c0_3 = arith.constant 0 : index
    %c0_4 = arith.constant 0 : index
    %6 = vector.load %arg10[%c0_3, %c0_4] : memref<16x128xbf16, #tpu.memory_space<vmem>>, vector<16x128xbf16>
    %cst = arith.constant dense<0.000000e+00> : vector<8x128xf32>
    %7 = tpu.matmul %5, %6, %cst {dimension_numbers = #tpu.dot_dimension_numbers<[1], [0], [0], [1], [0, 0, 1, 1], [], []>} : vector<8x16xbf16>, vector<16x128xbf16>, vector<8x128xf32> -> vector<8x128xf32>
    %c0_5 = arith.constant 0 : index
    %c0_6 = arith.constant 0 : index
    %8 = vector.load %arg11[%c0_5, %c0_6] : memref<1x128xf32, #tpu.memory_space<vmem>>, vector<1x128xf32>
    %9 = vector.broadcast %8 : vector<1x128xf32> to vector<8x128xf32>
    %10 = arith.addf %7, %9 : vector<8x128xf32>
    %c0_i32_7 = arith.constant 0 : i32
    %11 = arith.cmpi eq, %arg1, %c0_i32_7 : i32
    %12 = arith.extui %11 : i1 to i32
    %c0_i32_8 = arith.constant 0 : i32
    %13 = arith.cmpi ne, %12, %c0_i32_8 : i32
    scf.if %13 {
      %c0_10 = arith.constant 0 : index
      %c0_11 = arith.constant 0 : index
      %17 = vector.load %arg14[%c0_10, %c0_11] : memref<8x1xf32, #tpu.memory_space<vmem>>, vector<8x1xf32>
      %cst_12 = arith.constant dense<0xFF800000> : vector<8xf32>
      %18 = vector.multi_reduction <maximumf>, %10, %cst_12 [1] : vector<8x128xf32> to vector<8xf32>
      %19 = vector.shape_cast %18 : vector<8xf32> to vector<8x1xf32>
      %20 = arith.maximumf %17, %19 : vector<8x1xf32>
      %c0_13 = arith.constant 0 : index
      %c0_14 = arith.constant 0 : index
      %21 = vector.load %arg15[%c0_13, %c0_14] : memref<8x1xf32, #tpu.memory_space<vmem>>, vector<8x1xf32>
      %22 = arith.subf %17, %20 : vector<8x1xf32>
      %23 = math.exp %22 : vector<8x1xf32>
      %24 = arith.mulf %21, %23 : vector<8x1xf32>
      %25 = vector.broadcast %20 : vector<8x1xf32> to vector<8x128xf32>
      %26 = arith.subf %10, %25 : vector<8x128xf32>
      %27 = math.exp %26 : vector<8x128xf32>
      %cst_15 = arith.constant dense<0.000000e+00> : vector<8xf32>
      %28 = vector.multi_reduction <add>, %27, %cst_15 [1] : vector<8x128xf32> to vector<8xf32>
      %29 = vector.shape_cast %28 : vector<8xf32> to vector<8x1xf32>
      %30 = arith.addf %24, %29 : vector<8x1xf32>
      %c0_16 = arith.constant 0 : index
      %c0_17 = arith.constant 0 : index
      %31 = vector.load %arg15[%c0_16, %c0_17] : memref<8x1xf32, #tpu.memory_space<vmem>>, vector<8x1xf32>
      tpu.vector_store %arg15[%c0_16, %c0_17], %30 {strides = array<i32>} : memref<8x1xf32, #tpu.memory_space<vmem>>, vector<8x1xf32>,
      %c0_18 = arith.constant 0 : index
      %c0_19 = arith.constant 0 : index
      %32 = vector.load %arg14[%c0_18, %c0_19] : memref<8x1xf32, #tpu.memory_space<vmem>>, vector<8x1xf32>
      tpu.vector_store %arg14[%c0_18, %c0_19], %20 {strides = array<i32>} : memref<8x1xf32, #tpu.memory_space<vmem>>, vector<8x1xf32>,
    } else {
    }
    %c1_i32 = arith.constant 1 : i32
    %14 = arith.cmpi eq, %arg1, %c1_i32 : i32
    %15 = arith.extui %14 : i1 to i32
    %c0_i32_9 = arith.constant 0 : i32
    %16 = arith.cmpi ne, %15, %c0_i32_9 : i32
    scf.if %16 {
      %c0_10 = arith.constant 0 : index
      %c0_11 = arith.constant 0 : index
      %17 = vector.load %arg14[%c0_10, %c0_11] : memref<8x1xf32, #tpu.memory_space<vmem>>, vector<8x1xf32>
      %c0_12 = arith.constant 0 : index
      %c0_13 = arith.constant 0 : index
      %18 = vector.load %arg15[%c0_12, %c0_13] : memref<8x1xf32, #tpu.memory_space<vmem>>, vector<8x1xf32>
      %19 = math.log %18 : vector<8x1xf32>
      %20 = arith.addf %17, %19 : vector<8x1xf32>
      %21 = vector.broadcast %20 : vector<8x1xf32> to vector<8x128xf32>
      %22 = arith.subf %10, %21 : vector<8x128xf32>
      %c0_14 = arith.constant 0 : index
      %c0_15 = arith.constant 0 : index
      %23 = vector.load %arg12[%c0_14, %c0_15] : memref<8x128xf32, #tpu.memory_space<vmem>>, vector<8x128xf32>
      tpu.vector_store %arg12[%c0_14, %c0_15], %22 {strides = array<i32>} : memref<8x128xf32, #tpu.memory_space<vmem>>, vector<8x128xf32>,
    } else {
    }
    return
  }
  func.func @transform_0(%arg0: i32, %arg1: i32, %arg2: i32) -> (i32, i32) {
    %c0_i32 = arith.constant 0 : i32
    %c0_i32_0 = arith.constant 0 : i32
    return %arg0, %c0_i32 : i32, i32
  }
  func.func @transform_1(%arg0: i32, %arg1: i32, %arg2: i32) -> (i32, i32) {
    %c0_i32 = arith.constant 0 : i32
    %c0_i32_0 = arith.constant 0 : i32
    %c0_i32_1 = arith.constant 0 : i32
    return %c0_i32, %c0_i32_0 : i32, i32
  }
  func.func @transform_2(%arg0: i32, %arg1: i32, %arg2: i32) -> (i32, i32) {
    %c0_i32 = arith.constant 0 : i32
    %c0_i32_0 = arith.constant 0 : i32
    %c0_i32_1 = arith.constant 0 : i32
    return %c0_i32, %c0_i32_0 : i32, i32
  }
  func.func @transform_3(%arg0: i32, %arg1: i32, %arg2: i32) -> (i32, i32) {
    %c0_i32 = arith.constant 0 : i32
    %c0_i32_0 = arith.constant 0 : i32
    %c0_i32_1 = arith.constant 0 : i32
    return %c0_i32, %c0_i32_0 : i32, i32
  }
  func.func @transform_4(%arg0: i32, %arg1: i32, %arg2: i32) -> (i32, i32) {
    %c0_i32 = arith.constant 0 : i32
    %c0_i32_0 = arith.constant 0 : i32
    %c0_i32_1 = arith.constant 0 : i32
    return %c0_i32, %c0_i32_0 : i32, i32
  }
  func.func @transform_5(%arg0: i32, %arg1: i32, %arg2: i32) -> (i32, i32) {
    %c0_i32 = arith.constant 0 : i32
    %c0_i32_0 = arith.constant 0 : i32
    %c0_i32_1 = arith.constant 0 : i32
    return %c0_i32, %c0_i32_0 : i32, i32
  }
  func.func @transform_6(%arg0: i32, %arg1: i32, %arg2: i32) -> (i32, i32) {
    %c0_i32 = arith.constant 0 : i32
    %c0_i32_0 = arith.constant 0 : i32
    %c0_i32_1 = arith.constant 0 : i32
    return %c0_i32, %c0_i32_0 : i32, i32
  }
  func.func @transform_7(%arg0: i32, %arg1: i32, %arg2: i32) -> (i32, i32) {
    %c0_i32 = arith.constant 0 : i32
    %c0_i32_0 = arith.constant 0 : i32
    return %c0_i32, %arg2 : i32, i32
  }
  func.func @transform_8(%arg0: i32, %arg1: i32, %arg2: i32) -> (i32, i32) {
    %c0_i32 = arith.constant 0 : i32
    %c0_i32_0 = arith.constant 0 : i32
    return %c0_i32, %arg2 : i32, i32
  }
  func.func @transform_9(%arg0: i32, %arg1: i32, %arg2: i32) -> (i32, i32) {
    %0 = arith.muli %arg1, %arg2 : i32
    %c0_i32 = arith.constant 0 : i32
    return %arg0, %0 : i32, i32
  }
}

</mosaic_0001>

<bundles_post_ra>
// kernel: tpu_custom_call.1
= control target key start
LH: loop header
LB: loop body
LE: loop exit
PB: predicated region body
PF: predicated region fallthrough
CT: control target
= control target key end

     0   :  { %14 = vsyncpa [#allocation6], 0  ;;  %s1314_s0 = inlined_call_operand.vmem [shape: bf16[16,32], index: 0, kind: input, shape index: {}]   ;;  %s1315_s1 = inlined_call_operand.vmem [shape: bf16[32,32], index: 1, kind: input, shape index: {}]   ;;  %s1316_s2 = inlined_call_operand.vmem [shape: f32[1,32], index: 2, kind: input, shape index: {}]   ;;  %s1317_s3 = inlined_call_operand.hbm [shape: bf16[32,32], index: 3, kind: input, shape index: {}]   ;;  %s1318_s4 = inlined_call_operand.vmem [shape: f32[1,32], index: 4, kind: input, shape index: {}]   ;;  %s1319_s5 = inlined_call_operand.vmem [shape: bf16[32,16], index: 5, kind: input, shape index: {}]   ;;  %s1320_s6 = inlined_call_operand.vmem [shape: f32[1,16], index: 6, kind: input, shape index: {}]   ;;  %s1321_s7 = inlined_call_operand.hbm [shape: bf16[16,128], index: 7, kind: input, shape index: {}]   ;;  %s1322_s8 = inlined_call_operand.vmem [shape: f32[1,128], index: 8, kind: input, shape index: {}]   ;;  %s1323_s9 = inlined_call_operand.hbm [shape: f32[16,128], index: 9, kind: output, shape index: {}]  }
   0x1   :  { %15 = vsyncpa [#allocation9], 0 }
   0x2   :  { %16 = vsyncpa [#allocation7], 0 }
   0x3   :  { %18 = vsyncpa [#allocation7 + $0x1], 0  ;;  %s1126_s30 = smov 0   ;;  %s1128_s10 = smov 0  }
   0x4   :  { %s1130_s11 = smov 0   ;;  %s1132_s12 = smov 0  }
   0x5   :  { %s1134_s13 = smov 0   ;;  %s1136_s14 = smov 0  }
   0x6   :  { %s1138_s15 = smov 0   ;;  %s1140_s16 = smov 0  }
   0x7 LB: > { %1329 = sst [smem:[#allocation14_spill]] %s1038_s30  ;;  %s735_s17 = sadd.s32 4294967295, %s1066_s16   ;;  %s1066_s16 = sphi %s1140_s16, %s24_s16   ;;  %s1062_s15 = sphi %s1138_s15, %s1344_s15   ;;  %s1058_s14 = sphi %s1136_s14, %s1343_s14   ;;  %s1054_s13 = sphi %s1134_s13, %s1342_s13   ;;  %s1050_s12 = sphi %s1132_s12, %s1341_s12   ;;  %s1046_s11 = sphi %s1130_s11, %s1347_s11   ;;  %s1042_s10 = sphi %s1128_s10, %s1346_s10   ;;  %s1038_s30 = sphi %s1126_s30, %s1345_s30  }
   0x8   : > { %1330 = sst [smem:[#allocation15_spill]] %s1058_s14  ;;  %s736_s18 = sadd.s32 4294967294, %s1066_s16  }
   0x9   : > { %1331 = sst [smem:[#allocation16_spill]] %s1062_s15  ;;  %s39_s19 = sadd.s32 1, %s1058_s14 }
   0xa   : > { %s43_s20 = sadd.s32 1, %s1062_s15  ;;  %p41_p0 = scmp.ge.s32.totalorder %s39_s19, 2 }
   0xb   : > { %s258_s21 = sadd.s32 1, %s1046_s11  ;;  %p268_p1 = scmp.ne.s32.totalorder %s1046_s11, %s1042_s10 }
   0xc   : > { %p269_p2 = scmp.eq.s32.totalorder %s735_s17, 3  ;;  %s1349_s19 = smov (%p41_p0, %s39_s19), 0 }
   0xd   : > { %1332 = sst [smem:[#allocation17_spill]] %s1349_s19  ;;  %s1351_s20 = smov (!%p41_p0, %s43_s20), %s1062_s15 }
   0xe   : > { %p1176_p3 = por %p269_p2, %p268_p1  ;;  %p274_p4 = scmp.ne.s32.totalorder %s1042_s10, %s1038_s30 }
   0xf   : > { %p45_p5 = scmp.ge.s32.totalorder %s1351_s20, 2  ;;  %p275_p6 = scmp.eq.s32.totalorder %s736_s18, 3 }
  0x10   : > { %p737_p7 = scmp.ge.s32.totalorder %s1066_s16, 1  ;;  %p282_p8 = scmp.lt.s32.totalorder %s1066_s16, 5 }
  0x11   : > { %s1353_s20 = smov (%p45_p5, %s1351_s20), 0  ;;  %p1186_p9 = por %p275_p6, %p274_p4 }
  0x12   : > { %1334 = sst [smem:[#allocation18_spill]] %s1353_s20  ;;  %p1190_p10 = pnand %p737_p7, %p282_p8 }
  0x13   : > { %s1335_s23 = scalar_select %p1186_p9, 1, 0 }
  0x14   : > { %s253_s25 = ssub.s32 %s1062_s15, %s1353_s20  ;;  %p804_p12 = pneg %p1190_p10 }
  0x15   : > { %1336 = sst [smem:[#allocation19_spill]] %s1335_s23  ;;  %p256_p11 = scmp.eq.s32.totalorder %s253_s25, 0 }
  0x16   : > { %p1198_p13 = scmp.eq.s32.totalorder %s735_s17, 0  ;;  %s299_s29 = sshll.u32 %s1317_s3, 4  ;;  %s300_s29 = int_to_ptr.hbm [resolvable:$true] %s299_s29 }
  0x17   : > { %s1206_s18 = scalar_select %p256_p11, %s1046_s11, %s258_s21  }
  0x18   : > { %s1068_s19 = smov [#allocation5]   ;;  %p805_p0 = pnand %p1198_p13, %p804_p12 }
  0x19   : > { %s301_s14 = sshll.u32 %s1068_s19, 4  ;;  %s1069_s25 = smov 64   ;;  %s302_s14 = int_to_ptr.vmem [resolvable:$true] %s301_s14 }
  0x1a   : > { %s1070_s20 = smov 4   ;;  %s324_s23 = sshll.u32 %s1321_s7, 4  ;;  %s325_s23 = int_to_ptr.hbm [resolvable:$true] %s324_s23 }
  0x1b   : > { %807 = dma.hbm_to_vmem [thread:$0]  (!%p805_p0), %s300_s29, 256, %s302_s14, [#allocation6], %s1069_s25, %s1069_s25, %s1070_s20  }
  0x1c   : > { %s1071_s30 = smov [#allocation8]   ;;  %355 = sbr.rel (%p1190_p10) target bundleno = 1105 (0x451), region = 56 }
  0x1d   : > { %s326_s27 = sshll.u32 %s1071_s30, 4  ;;  %s327_s27 = int_to_ptr.vmem [resolvable:$true] %s326_s27 }
  0x1e   : > { %810 = dma.hbm_to_vmem [thread:$0]  (!%p805_p0), %s325_s23, 128, %s327_s27, [#allocation9], %s1069_s25, %s1069_s25, %s1070_s20  }
  0x21   : > { %1025 = dma.done.wait (%p1198_p13), [#allocation6], 256  }
  0x22   : > { %1027 = vsyncadd (%p1198_p13), [#allocation6], 4294967040 }
  0x23   : > { %1029 = dma.done.wait (%p1198_p13), [#allocation9], 128  }
  0x24   : > { %1031 = vsyncadd (%p1198_p13), [#allocation9], 4294967168  ;;  %s396_s30 = sand.u32 1, %s1042_s10   ;;  %p399_p1 = scmp.lt.s32.totalorder %s1054_s13, 1 }
  0x25   : > { %s1227_s14 = sshll.u32 %s396_s30, 3  ;;  %p408_p2 = scmp.eq.s32.totalorder %s1050_s12, 0 }
  0x26   : > { %s400_s15 = scalar_select %p399_p1, %s1054_s13, 1  ;;  %v788_v0 = vld [vmem:[%s1315_s1 + $0x8] sm:$0xff] (%p408_p2)  ;;  %v787_v1 = vld [vmem:[%s1315_s1] sm:$0xff] (%p408_p2)  ;;  %vm435_vm0 = vcmask (%p408_p2), 261120   ;;  %v789_v4 = vld [vmem:[#allocation5] sm:$0xff] (%p408_p2)  ;;  %vm532_vm1 = vcmask (%p408_p2), 7168  }
  0x27   : > { %s398_s24 = scalar_lea.vmem [#allocation10], %s1227_s14  ;;  %413 = sbr.rel (!%p408_p2) target bundleno = 450 (0x1c2), region = 68  ;;  %445 = vmatpush.bf16.msra.mxu0 (%p408_p2), %v788_v0  ;;  %v790_v3 = vld [vmem:[#allocation5 + $0x8] sm:$0xff] (%p408_p2)  ;;  %v792_v11 = vld [vmem:[%s1319_s5 + $0x8] sm:$0xff] (%p408_p2)  ;;  %v1072_v19 = vmov (%p408_p2), -inf   ;;  %v1073_v20 = vmov (%p408_p2), 0.0  }
  0x28   : > { %s746_s19 = sshll.u32 %s400_s15, 2  ;;  %483 = vmatpush.bf16.msra.mxu1 (%p408_p2), %v790_v3  ;;  %v892_v5 = vld [vmem:[%s1316_s2] ss:$0 sm:$0xff] (%p408_p2)  ;;  %521 = vmatpush.bf16.msra.mxu2 (%p408_p2), %v792_v11  ;;  %533 = vst.msk [vmem:[#allocation3] sm:$0xff] (%p408_p2), %vm532_vm1, %v1072_v19  ;;  %vm530_vm2 = vcmask (%p408_p2), 125952  }
  0x29   : > { %s402_s23 = scalar_lea.vmem %s1314_s0, %s746_s19  ;;  %v791_v12 = vld [vmem:[%s1319_s5] sm:$0xff] (%p408_p2)  ;;  %534 = vst.msk [vmem:[#allocation4] sm:$0xff] (%p408_p2), %vm532_vm1, %v1073_v20 }
  0x2a   : > { %v414_v2 = vld [vmem:[%s402_s23] sm:$0xf] (%p408_p2) }
  0x2b   : > { %446 = vmatpush.bf16.msra.mxu0 (%p408_p2), %v787_v1  ;;  %v893_v13 = vld [vmem:[%s1318_s4] ss:$0 sm:$0xff] (%p408_p2) }
  0x2c   : > { %484 = vmatpush.bf16.msra.mxu1 %v789_v4  ;;  %522 = vmatpush.bf16.msra.mxu2 %v791_v12  ;;  %v894_v21 = vld [vmem:[%s1320_s6] ss:$0 sm:$0xff] }
  0x2e   : > { %756 = vmatmul.msk.bf16.vlgmr.msra.gmra.mxu0 %vm435_vm0, %v414_v2 }
  0xab   : > { %v448_v6 = vpop.f32.mrf.mxu0 }
  0xac   : > { %v449_v7 = vadd.f32 %v892_v5, %v448_v6 }
  0xae   : > { %v452_v8 = vmax.f32 %v449_v7, 0.0 }
  0xb0   : > { %v453_v9 = vpack.c.bf16 %v452_v8, %v452_v8 }
  0xb2   : > { %765 = vmatmul.msk.bf16.vlgmr.msra.gmra.mxu1 %vm435_vm0, %v453_v9 }
  0xb3   : > { %v450_v10 = vpop.f32.mrf.mxu0 }
 0x12f   : > { %v486_v14 = vpop.f32.mrf.mxu1 }
 0x130   : > { %v487_v15 = vadd.f32 %v893_v13, %v486_v14 }
 0x132   : > { %v490_v16 = vmax.f32 %v487_v15, 0.0 }
 0x134   : > { %v491_v17 = vpack.c.bf16 %v490_v16, %v490_v16 }
 0x136   : > { %774 = vmatmul.msk.bf16.vlgmr.msra.gmra.mxu2 %vm435_vm0, %v491_v17 }
 0x137   : > { %v488_v18 = vpop.f32.mrf.mxu1 }
 0x1b9   : > { %v524_v22 = vpop.f32.mrf.mxu2 }
 0x1ba   : > { %v525_v23 = vadd.f32 %v894_v21, %v524_v22 }
 0x1bc   : > { %v528_v24 = vmax.f32 %v525_v23, 0.0 }
 0x1be   : > { %v529_v25 = vpack.c.bf16 %v528_v24, %v528_v24 }
 0x1c0   : > { %531 = vst.msk [vmem:[#allocation2] sm:$0xf] %vm530_vm2, %v529_v25 }
 0x1c1   : > { %v526_v26 = vpop.f32.mrf.mxu2 }
 0x1c2 PF: > { %v793_v27 = vld [vmem:[#allocation8] sm:$0xff]  ;;  %vm548_vm3 = vcmask 130048   ;;  %v895_v29 = vld [vmem:[%s1322_s8] ss:$0 sm:$0xff]  ;;  %p780_p4 = scmp.ne.s32.totalorder %s1050_s12, 0 }
 0x1c3   : > { %559 = vmatpush.bf16.msra.mxu0 %v793_v27 }
 0x1c7   : > { %v535_v28 = vld [vmem:[#allocation2] sm:$0xf] }
 0x1c8   : > { %779 = vmatmul.msk.bf16.vlgmr.msra.gmra.mxu0 %vm548_vm3, %v535_v28 }
 0x245   : > { %v561_v30 = vpop.f32.mrf.mxu0 }
 0x246   : > { %v562_v31 = vadd.f32 %v895_v29, %v561_v30 }
 0x249   : > { %567 = sbr.rel (%p780_p4) target bundleno = 953 (0x3b9), region = 72 }
 0x24d   : > { %v563_v32 = vpop.f32.mrf.mxu0 }
 0x24e   : > { %569 = vmax.xlane.f32.xlu0 %v562_v31  ;;  %v1074_v33 = vmov 0   ;;  %v568_v34 = vld [vmem:[#allocation3] sm:$0xff]  ;;  %vm588_vm4 = vcmask 7168   ;;  %v572_v44 = vld [vmem:[#allocation4] sm:$0xff] }
 0x24f   : > { %896 = vset.pattern.permute.xlu0 %v1074_v33 }
 0x2c1   : > { %v570_v35 = vpop.xlane.xlu0 %569 }
 0x2c2   : > { %v571_v36 = vmax.f32 %v568_v34, %v570_v35 }
 0x2c4   : > { %v573_v37 = vsub.f32 %v568_v34, %v571_v36  ;;  %590 = vst.msk [vmem:[#allocation3] sm:$0xff] %vm588_vm4, %v571_v36  ;;  %579 = vperm.xlu0 %896, %v571_v36  }
 0x2c6   : > { %v574_v42 = vmul.f32 1.442695, %v573_v37 }
 0x336   : > { %v580_v38 = vpop.permute.xlu0 %579 }
 0x337   : > { %v582_v39 = vsub.f32 %v562_v31, %v580_v38 }
 0x339   : > { %v583_v40 = vmul.f32 1.442695, %v582_v39 }
 0x33b   : > { %897 = vpow2.f32 %v583_v40 }
 0x33c   : > { %899 = vpow2.f32 %v574_v42 }
 0x341   : > { %v898_v41 = vpop.eup %897 }
 0x342   : > { %585 = vadd.xlane.f32.xlu1 %v898_v41  ;;  %v900_v43 = vpop.eup %899 }
 0x343   : > { %v576_v45 = vmul.f32 %v900_v43, %v572_v44 }
 0x3b5   : > { %v586_v46 = vpop.xlane.xlu1 %585 }
 0x3b6   : > { %v587_v47 = vadd.f32 %v586_v46, %v576_v45 }
 0x3b8   : > { %589 = vst.msk [vmem:[#allocation4] sm:$0xff] %vm588_vm4, %v587_v47 }
 0x3b9 PF: > { %p781_p5 = scmp.ne.s32.totalorder %s1050_s12, 1 }
 0x3bb   : > { %594 = sbr.rel (%p781_p5) target bundleno = 1090 (0x442), region = 76 }
 0x3c0   : > { %v596_v48 = vld [vmem:[#allocation4] sm:$0xff]  ;;  %v1075_v49 = vmov 0   ;;  %v595_v51 = vld [vmem:[#allocation3] sm:$0xff] }
 0x3c1   : > { %901 = vset.pattern.permute.xlu0 %v1075_v49  ;;  %902 = vlog2.f32 %v596_v48 }
 0x3c7   : > { %v903_v50 = vpop.eup %902 }
 0x3c8   : > { %v598_v52 = vmul.f32 0.6931472, %v903_v50 }
 0x3ca   : > { %v599_v53 = vadd.f32 %v598_v52, %v595_v51 }
 0x3cc   : > { %602 = vperm.xlu0 %901, %v599_v53  }
 0x43e   : > { %v603_v54 = vpop.permute.xlu0 %602 }
 0x43f   : > { %v605_v55 = vsub.f32 %v562_v31, %v603_v54 }
 0x441   : > { %606 = vst [vmem:[%s398_s24] sm:$0xff] %v605_v55 }
 0x442 PF: > { %s783_s12 = sshll.u32 %s1054_s13, 3  ;;  %s622_s20 = sshll.u32 %s398_s24, 4  ;;  %s623_s20 = int_to_ptr.vmem [resolvable:$true] %s622_s20 }
 0x443   : > { %s620_s19 = scalar_lea.hbm %s1323_s9, %s783_s12  ;;  %s608_s23 = scalar_lea.sflag [#allocation7], %s396_s30 }
 0x444   : > { %s624_s21 = sshll.u32 %s620_s19, 4  ;;  %s984_s25 = scalar_lea.hbm %s1323_s9, 16  ;;  %s625_s21 = int_to_ptr.hbm [resolvable:$true] %s624_s21 }
 0x445   : > { %s978_s26 = sshra.s32 %s625_s21, 4  ;;  %s979_s26 = int_to_ptr.hbm [resolvable:$true] %s978_s26 }
 0x446   : > { %s980_s28 = scalar_lea.hbm %s979_s26, 8  ;;  %p985_p10 = scmp.lt.s32.totalorder %s979_s26, %s1323_s9 }
 0x447   : > { %p981_p6 = scmp.ne.s32.totalorder %s979_s26, %s980_s28  ;;  %p986_p11 = scmp.lt.s32.totalorder %s984_s25, %s980_s28 }
 0x449   : > { %p982_p7 = pnand %p981_p6, %p1176_p3  ;;  %p987_p12 = por %p986_p11, %p985_p10 }
 0x44b   : > { %p983_p8 = pneg %p982_p7 }
 0x44d   : > { %p988_p13 = pnand %p987_p12, %p983_p8 }
 0x44f   : > { %991 = shalt.err (!%p988_p13)
}
 0x450   : > { %802 = dma.vmem_to_hbm [thread:$0]  (%p1176_p3), %s623_s20, 128, %s625_s21, %s608_s23  }
 0x451 PF: > { %s1339_s30 = sld [smem:[#allocation14_spill]]  ;;  %p819_p0 = scmp.ge.s32.totalorder %s1066_s16, 2 }
 0x453   : > { %p812_p1 = pnand %p819_p0, %p1186_p9 }
 0x455   : > { %p813_p2 = pneg %p812_p1 }
 0x457   : > { %s636_s24 = sand.u32 1, %s1339_s30  }
 0x458   : > { %s637_s27 = scalar_lea.sflag [#allocation7], %s636_s24 }
 0x459   : > { %1033 = dma.done.wait (%p813_p2), %s637_s27, 128  }
 0x45a   : > { %1035 = vsyncadd (%p813_p2), %s637_s27, 4294967168  ;;  %s24_s16 = sadd.s32 1, %s1066_s16   ;;  %s1341_s12 = sld [smem:[#allocation15_spill]] }
 0x45b   : > { %p21_p4 = scmp.ge.s32.totalorder %s24_s16, 6   ;;  %s1342_s13 = sld [smem:[#allocation16_spill]] }
 0x45c   : > { %s1343_s14 = sld [smem:[#allocation17_spill]]  ;;  %s1345_s30 = smov %s1042_s10 }
 0x45d   : > { %s1344_s15 = sld [smem:[#allocation18_spill]]  ;;  %s1346_s10 = smov %s1046_s11 }
 0x45e   : > { %s1347_s11 = smov %s1206_s18  ;;  %23 = sbr.rel (!%p21_p4) target bundleno = 7 (0x7), region = 116 }
 0x463   :  { %643 = vsyncpa [#allocation6], 1 }
 0x464   :  { %645 = vsyncpa [#allocation6 + $0x1], 1 }
 0x465   :  { %646 = vsyncpa [#allocation9], 1 }
 0x466   :  { %647 = vsyncpa [#allocation7], 1 }
 0x467   :  { %649 = vsyncpa [#allocation7 + $0x1], 1 }

</bundles_post_ra>
